<compile_context>
chip_gen: v5e
topology: v5e:2x2
jax: 0.10.0
libtpu: 0.0.40
codegen_flags: <defaults>
</compile_context>

<pallas_src>
import jax
import jax.numpy as jnp
from jax import lax
from jax.experimental import pallas as pl
from jax.experimental.pallas import tpu as pltpu


def nomad_trunk_kernel(xt_ref, hb_ref, wt1c_ref, wt2_ref, bt2_ref, out_ref):
    """One (batch b, query-tile q) grid step, computed in transposed layout.

    xt_ref  : (1, n_trunk, TQ)   x_trunk tile, queries along lanes
    hb_ref  : (1, H_T, 1)        per-batch fold: branch(x_b) @ W1_br + b1
    wt1c_ref: (n_trunk, H_T, 1)  trunk layer-1 weight columns (trunk part)
    wt2_ref : (H_T, n_output)    trunk layer-2 weight
    bt2_ref : (n_output, 1)      trunk layer-2 bias (column)
    out_ref : (1, n_output, TQ)  lane-dense output slab
    """
    n_trunk = xt_ref.shape[1]
    n_output = wt2_ref.shape[1]

    xt = xt_ref[0]                       # (n_trunk, TQ) f32
    hb = hb_ref[0]                       # (H_T, 1)      f32

    # ---- trunk layer 1: h = relu(W1_tr^T @ xt + hbias) ---------------------
    if n_trunk <= 8:
        # K is tiny: exact-f32 VPU broadcast-MACs; uses otherwise-idle VALU
        # slots and avoids paying MXU weight-load per tile for a K=4 matmul.
        h = hb
        for k in range(n_trunk):                          # static unroll
            h = h + wt1c_ref[k] * xt[k:k + 1, :]          # (H_T,1)*(1,TQ)->(H_T,TQ)
    else:
        w1 = wt1c_ref[...][:, :, 0]                       # (n_trunk, H_T)
        h = lax.dot_general(w1, xt, (((0,), (0,)), ((), ())),
                            preferred_element_type=jnp.float32) + hb
    h = jnp.maximum(h, 0.0)                               # (H_T, TQ)

    # ---- trunk layer 2 (identity final activation) --------------------------
    w2 = wt2_ref[...]                                     # (H_T, n_output)
    if n_output == 1:
        # VPU multiply + cross-sublane reduce (XLU); exact f32, MXU stays free.
        out = jnp.sum(h * w2, axis=0, keepdims=True) + bt2_ref[...]   # (1, TQ)
    else:
        out = lax.dot_general(w2, h, (((0,), (0,)), ((), ())),
                              preferred_element_type=jnp.float32) + bt2_ref[...]

    out_ref[0] = out.astype(out_ref.dtype)                # full-lane store


def _pick_q_tile(q, cap=512):
    """Largest lane-dense tile (multiple of 128, <= cap) that evenly divides q."""
    for t in (512, 384, 256, 128):
        if t <= cap and q % t == 0:
            return t
    return q    # fall back to the full query axis (block == full dim is legal)


def nomad_forward(x_branch, x_trunk, params, tq=None):
    """x_branch: (B, n_branch); x_trunk: (B, Q, n_trunk) -> (B, Q, n_output)."""
    (wb1, bb1, wb2, bb2, wt1_br, wt1_tr, bt1, wt2, bt2) = params

    if x_trunk.ndim == 2:                                  # mirrors the PyTorch .view
        x_trunk = x_trunk[:, None, :]
    B, Q, n_trunk = x_trunk.shape
    h_t = wt1_tr.shape[1]
    n_output = wt2.shape[1]

    if tq is None:
        tq = _pick_q_tile(Q)
    assert Q % tq == 0, "query tile must divide n_query"
    n_qtiles = Q // tq

    hp = lax.Precision.HIGHEST
    # Branch MLP + fold into the trunk layer-1 bias: O(B) work, plain XLA.
    #   trunk_layer1(concat(br, tr)) = tr @ W1_tr + (br @ W1_br + b1)
    hb_hidden = jnp.maximum(jnp.dot(x_branch, wb1, precision=hp) + bb1, 0.0)
    br = jnp.dot(hb_hidden, wb2, precision=hp) + bb2        # (B, n_inter)
    hbias = jnp.dot(br, wt1_br, precision=hp) + bt1         # (B, H_T)

    # Layout plumbing so the kernel is lane-dense along the query axis.
    xt_t = jnp.transpose(x_trunk, (0, 2, 1))                # (B, n_trunk, Q)
    hbias_col = hbias[:, :, None]                           # (B, H_T, 1)
    wt1_cols = wt1_tr[:, :, None]                           # (n_trunk, H_T, 1)
    bt2_col = bt2.reshape(n_output, 1)                      # (n_output, 1)

    def const_spec(shape):
        # Grid-constant weights: DMA'd once, VMEM-resident across all steps.
        # (pipeline_mode=pl.Buffered(1) could halve their resident VMEM on
        #  v7x at much larger widths; irrelevant at these sizes.)
        return pl.BlockSpec(shape, lambda b, q: (0,) * len(shape))

    grid_spec = pltpu.PrefetchScalarGridSpec(
        num_scalar_prefetch=0,
        grid=(B, n_qtiles),
        in_specs=[
            pl.BlockSpec((1, n_trunk, tq), lambda b, q: (b, 0, q)),  # x_trunk tile
            pl.BlockSpec((1, h_t, 1), lambda b, q: (b, 0, 0)),       # per-batch fold
            const_spec(wt1_cols.shape),
            const_spec(wt2.shape),
            const_spec(bt2_col.shape),
        ],
        out_specs=pl.BlockSpec((1, n_output, tq), lambda b, q: (b, 0, q)),
    )

    flops = 2 * B * Q * (n_trunk * h_t + h_t * n_output)
    bytes_accessed = 4 * (xt_t.size + hbias_col.size + wt1_cols.size
                          + wt2.size + bt2_col.size + B * n_output * Q)

    out_t = pl.pallas_call(
        nomad_trunk_kernel,
        out_shape=jax.ShapeDtypeStruct((B, n_output, Q), jnp.float32),
        grid_spec=grid_spec,
        compiler_params=pltpu.CompilerParams(
            # No cross-step carry anymore -> both axes may shard across cores.
            dimension_semantics=("parallel", "parallel"),
            vmem_limit_bytes=32 * 1024 * 1024),
        cost_estimate=pl.CostEstimate(
            flops=int(flops), transcendentals=0,
            bytes_accessed=int(bytes_accessed)),
    )(xt_t, hbias_col, wt1_cols, wt2, bt2_col)

    return jnp.transpose(out_t, (0, 2, 1))                  # (B, Q, n_output)


def nomad_reference(x_branch, x_trunk, params):
    """Pure-JAX reference mirroring the PyTorch NOMAD forward (with concat)."""
    (wb1, bb1, wb2, bb2, wt1_br, wt1_tr, bt1, wt2, bt2) = params
    if x_trunk.ndim == 2:
        x_trunk = x_trunk[:, None, :]
    B, Q, _ = x_trunk.shape
    hp = lax.Precision.HIGHEST
    br = jnp.dot(jnp.maximum(jnp.dot(x_branch, wb1, precision=hp) + bb1, 0.0),
                 wb2, precision=hp) + bb2                     # (B, n_inter)
    wt1 = jnp.concatenate([wt1_br, wt1_tr], axis=0)           # (n_inter+n_trunk, H_T)
    br_b = jnp.broadcast_to(br[:, None, :], (B, Q, br.shape[-1]))
    inp = jnp.concatenate([br_b, x_trunk], axis=-1)           # concat(br, tr)
    h = jnp.maximum(jnp.matmul(inp, wt1, precision=hp) + bt1, 0.0)
    return jnp.matmul(h, wt2, precision=hp) + bt2             # (B, Q, n_output)


def init_params(key, n_branch, n_trunk, n_inter, n_output, h_b, h_t):
    ks = jax.random.split(key, 9)
    def lin(k, fan_in, shape):
        return jax.random.normal(k, shape, jnp.float32) / jnp.sqrt(jnp.float32(fan_in))
    wb1 = lin(ks[0], n_branch, (n_branch, h_b))
    bb1 = 0.01 * jax.random.normal(ks[1], (1, h_b), jnp.float32)
    wb2 = lin(ks[2], h_b, (h_b, n_inter))
    bb2 = 0.01 * jax.random.normal(ks[3], (1, n_inter), jnp.float32)
    wt1_br = lin(ks[4], n_inter + n_trunk, (n_inter, h_t))
    wt1_tr = lin(ks[5], n_inter + n_trunk, (n_trunk, h_t))
    bt1 = 0.01 * jax.random.normal(ks[6], (1, h_t), jnp.float32)
    wt2 = lin(ks[7], h_t, (h_t, n_output))
    bt2 = 0.01 * jax.random.normal(ks[8], (1, n_output), jnp.float32)
    return (wb1, bb1, wb2, bb2, wt1_br, wt1_tr, bt1, wt2, bt2)


if __name__ == "__main__":
    # Small shapes consistent with the module's forward signature.
    n_batch, n_query = 2, 256
    n_branch, n_trunk, n_inter, n_output = 16, 4, 32, 1
    h_branch, h_trunk = 64, 128          # lane-aligned trunk hidden width

    key = jax.random.PRNGKey(0)
    k_params, k_xb, k_xt = jax.random.split(key, 3)

    params = init_params(k_params, n_branch, n_trunk, n_inter, n_output,
                         h_branch, h_trunk)
    x_branch = jax.random.normal(k_xb, (n_batch, n_branch), jnp.float32)
    x_trunk = jax.random.normal(k_xt, (n_batch, n_query, n_trunk), jnp.float32)

    # tq auto-picks the full query axis (256): grid (2, 1), lane-dense stores.
    out = nomad_forward(x_branch, x_trunk, params)
    out = jax.block_until_ready(out)

    ref = nomad_reference(x_branch, x_trunk, params)
    assert out.shape == (n_batch, n_query, n_output)
    assert jnp.allclose(out, ref, atol=1e-4, rtol=1e-4), "mismatch vs. reference"
    print("KERNEL_OK")
</pallas_src>

<mosaic_0001>
module attributes {stable_mosaic.version = 11 : i64} {
  func.func @nomad_trunk_kernel(%arg0: i32, %arg1: i32, %arg2: memref<1x4x256xf32, #tpu.memory_space<vmem>>, %arg3: memref<1x128x1xf32, #tpu.memory_space<vmem>>, %arg4: memref<4x128x1xf32, #tpu.memory_space<vmem>>, %arg5: memref<128x1xf32, #tpu.memory_space<vmem>>, %arg6: memref<1x1xf32, #tpu.memory_space<vmem>>, %arg7: memref<1x1x256xf32, #tpu.memory_space<vmem>>) attributes {dimension_semantics = [#tpu.dimension_semantics<parallel>, #tpu.dimension_semantics<parallel>], iteration_bounds = array<i64: 2, 1>, scalar_prefetch = 0 : i64, scratch_operands = 0 : i64, tpu.core_type = #tpu.core_type<tc>, window_params = [{transform_indices = @transform_0, window_bounds = array<i64: 1, 4, 256>}, {transform_indices = @transform_1, window_bounds = array<i64: 1, 128, 1>}, {pipeline_mode = #tpu.pipeline_mode<synchronous>, transform_indices = @transform_2, window_bounds = array<i64: 4, 128, 1>}, {pipeline_mode = #tpu.pipeline_mode<synchronous>, transform_indices = @transform_3, window_bounds = array<i64: 128, 1>}, {pipeline_mode = #tpu.pipeline_mode<synchronous>, transform_indices = @transform_4, window_bounds = array<i64: 1, 1>}, {transform_indices = @transform_5, window_bounds = array<i64: 1, 1, 256>}]} {
    %c0 = arith.constant 0 : index
    %c0_0 = arith.constant 0 : index
    %c0_1 = arith.constant 0 : index
    %0 = vector.load %arg2[%c0, %c0_0, %c0_1] : memref<1x4x256xf32, #tpu.memory_space<vmem>>, vector<1x4x256xf32>
    %1 = vector.shape_cast %0 : vector<1x4x256xf32> to vector<4x256xf32>
    %c0_2 = arith.constant 0 : index
    %c0_3 = arith.constant 0 : index
    %c0_4 = arith.constant 0 : index
    %2 = vector.load %arg3[%c0_2, %c0_3, %c0_4] : memref<1x128x1xf32, #tpu.memory_space<vmem>>, vector<1x128x1xf32>
    %3 = vector.shape_cast %2 : vector<1x128x1xf32> to vector<128x1xf32>
    %c0_5 = arith.constant 0 : index
    %c0_6 = arith.constant 0 : index
    %c0_7 = arith.constant 0 : index
    %4 = vector.load %arg4[%c0_5, %c0_6, %c0_7] : memref<4x128x1xf32, #tpu.memory_space<vmem>>, vector<1x128x1xf32>
    %5 = vector.shape_cast %4 : vector<1x128x1xf32> to vector<128x1xf32>
    %6 = vector.extract_strided_slice %1 {offsets = [0, 0], sizes = [1, 256], strides = [1, 1]} : vector<4x256xf32> to vector<1x256xf32>
    %7 = vector.broadcast %5 : vector<128x1xf32> to vector<128x256xf32>
    %8 = vector.broadcast %6 : vector<1x256xf32> to vector<128x256xf32>
    %9 = arith.mulf %7, %8 : vector<128x256xf32>
    %10 = vector.broadcast %3 : vector<128x1xf32> to vector<128x256xf32>
    %11 = arith.addf %10, %9 : vector<128x256xf32>
    %c1 = arith.constant 1 : index
    %c0_8 = arith.constant 0 : index
    %c0_9 = arith.constant 0 : index
    %12 = vector.load %arg4[%c1, %c0_8, %c0_9] : memref<4x128x1xf32, #tpu.memory_space<vmem>>, vector<1x128x1xf32>
    %13 = vector.shape_cast %12 : vector<1x128x1xf32> to vector<128x1xf32>
    %14 = vector.extract_strided_slice %1 {offsets = [1, 0], sizes = [1, 256], strides = [1, 1]} : vector<4x256xf32> to vector<1x256xf32>
    %15 = vector.broadcast %13 : vector<128x1xf32> to vector<128x256xf32>
    %16 = vector.broadcast %14 : vector<1x256xf32> to vector<128x256xf32>
    %17 = arith.mulf %15, %16 : vector<128x256xf32>
    %18 = arith.addf %11, %17 : vector<128x256xf32>
    %c2 = arith.constant 2 : index
    %c0_10 = arith.constant 0 : index
    %c0_11 = arith.constant 0 : index
    %19 = vector.load %arg4[%c2, %c0_10, %c0_11] : memref<4x128x1xf32, #tpu.memory_space<vmem>>, vector<1x128x1xf32>
    %20 = vector.shape_cast %19 : vector<1x128x1xf32> to vector<128x1xf32>
    %21 = vector.extract_strided_slice %1 {offsets = [2, 0], sizes = [1, 256], strides = [1, 1]} : vector<4x256xf32> to vector<1x256xf32>
    %22 = vector.broadcast %20 : vector<128x1xf32> to vector<128x256xf32>
    %23 = vector.broadcast %21 : vector<1x256xf32> to vector<128x256xf32>
    %24 = arith.mulf %22, %23 : vector<128x256xf32>
    %25 = arith.addf %18, %24 : vector<128x256xf32>
    %c3 = arith.constant 3 : index
    %c0_12 = arith.constant 0 : index
    %c0_13 = arith.constant 0 : index
    %26 = vector.load %arg4[%c3, %c0_12, %c0_13] : memref<4x128x1xf32, #tpu.memory_space<vmem>>, vector<1x128x1xf32>
    %27 = vector.shape_cast %26 : vector<1x128x1xf32> to vector<128x1xf32>
    %28 = vector.extract_strided_slice %1 {offsets = [3, 0], sizes = [1, 256], strides = [1, 1]} : vector<4x256xf32> to vector<1x256xf32>
    %29 = vector.broadcast %27 : vector<128x1xf32> to vector<128x256xf32>
    %30 = vector.broadcast %28 : vector<1x256xf32> to vector<128x256xf32>
    %31 = arith.mulf %29, %30 : vector<128x256xf32>
    %32 = arith.addf %25, %31 : vector<128x256xf32>
    %cst = arith.constant 0.000000e+00 : f32
    %33 = vector.broadcast %cst : f32 to vector<128x256xf32>
    %34 = arith.maximumf %32, %33 : vector<128x256xf32>
    %c0_14 = arith.constant 0 : index
    %c0_15 = arith.constant 0 : index
    %35 = vector.load %arg5[%c0_14, %c0_15] : memref<128x1xf32, #tpu.memory_space<vmem>>, vector<128x1xf32>
    %36 = vector.broadcast %35 : vector<128x1xf32> to vector<128x256xf32>
    %37 = arith.mulf %34, %36 : vector<128x256xf32>
    %cst_16 = arith.constant dense<0.000000e+00> : vector<256xf32>
    %38 = vector.multi_reduction <add>, %37, %cst_16 [0] : vector<128x256xf32> to vector<256xf32>
    %39 = vector.shape_cast %38 : vector<256xf32> to vector<1x256xf32>
    %c0_17 = arith.constant 0 : index
    %c0_18 = arith.constant 0 : index
    %40 = vector.load %arg6[%c0_17, %c0_18] : memref<1x1xf32, #tpu.memory_space<vmem>>, vector<1x1xf32>
    %41 = vector.broadcast %40 : vector<1x1xf32> to vector<1x256xf32>
    %42 = arith.addf %39, %41 : vector<1x256xf32>
    %c0_19 = arith.constant 0 : index
    %c0_20 = arith.constant 0 : index
    %c0_21 = arith.constant 0 : index
    %43 = vector.load %arg7[%c0_19, %c0_20, %c0_21] : memref<1x1x256xf32, #tpu.memory_space<vmem>>, vector<1x1x256xf32>
    %44 = vector.shape_cast %43 : vector<1x1x256xf32> to vector<1x256xf32>
    %45 = vector.shape_cast %42 : vector<1x256xf32> to vector<1x1x256xf32>
    tpu.vector_store %arg7[%c0_19, %c0_20, %c0_21], %45 {strides = array<i32>} : memref<1x1x256xf32, #tpu.memory_space<vmem>>, vector<1x1x256xf32>,
    return
  }
  func.func @transform_0(%arg0: i32, %arg1: i32) -> (i32, i32, i32) {
    %c0_i32 = arith.constant 0 : i32
    %c0_i32_0 = arith.constant 0 : i32
    return %arg0, %c0_i32, %arg1 : i32, i32, i32
  }
  func.func @transform_1(%arg0: i32, %arg1: i32) -> (i32, i32, i32) {
    %c0_i32 = arith.constant 0 : i32
    %c0_i32_0 = arith.constant 0 : i32
    %c0_i32_1 = arith.constant 0 : i32
    return %arg0, %c0_i32, %c0_i32_0 : i32, i32, i32
  }
  func.func @transform_2(%arg0: i32, %arg1: i32) -> (i32, i32, i32) {
    %c0_i32 = arith.constant 0 : i32
    %c0_i32_0 = arith.constant 0 : i32
    %c0_i32_1 = arith.constant 0 : i32
    %c0_i32_2 = arith.constant 0 : i32
    return %c0_i32, %c0_i32_0, %c0_i32_1 : i32, i32, i32
  }
  func.func @transform_3(%arg0: i32, %arg1: i32) -> (i32, i32) {
    %c0_i32 = arith.constant 0 : i32
    %c0_i32_0 = arith.constant 0 : i32
    %c0_i32_1 = arith.constant 0 : i32
    return %c0_i32, %c0_i32_0 : i32, i32
  }
  func.func @transform_4(%arg0: i32, %arg1: i32) -> (i32, i32) {
    %c0_i32 = arith.constant 0 : i32
    %c0_i32_0 = arith.constant 0 : i32
    %c0_i32_1 = arith.constant 0 : i32
    return %c0_i32, %c0_i32_0 : i32, i32
  }
  func.func @transform_5(%arg0: i32, %arg1: i32) -> (i32, i32, i32) {
    %c0_i32 = arith.constant 0 : i32
    %c0_i32_0 = arith.constant 0 : i32
    return %arg0, %c0_i32, %arg1 : i32, i32, i32
  }
}

</mosaic_0001>

<bundles_post_ra>
// kernel: tpu_custom_call.1
= control target key start
LH: loop header
LB: loop body
LE: loop exit
PB: predicated region body
PF: predicated region fallthrough
CT: control target
= control target key end

     0   :  { %s2475_s0 = inlined_call_operand.vmem [shape: f32[2,4,256], index: 0, kind: input, shape index: {}]   ;;  %s2476_s1 = inlined_call_operand.vmem [shape: f32[2,128,1], index: 1, kind: input, shape index: {}]   ;;  %s2477_s2 = inlined_call_operand.vmem [shape: f32[4,128,1], index: 2, kind: input, shape index: {}]   ;;  %s2478_s3 = inlined_call_operand.vmem [shape: f32[128,1], index: 3, kind: input, shape index: {}]   ;;  %s2479_s4 = inlined_call_operand.<no memory space> [shape: f32[1,1], index: 4, kind: input, shape index: {}]   ;;  %s2480_s5 = inlined_call_operand.hbm [shape: f32[2,1,256], index: 5, kind: output, shape index: {}]  }
   0x1   :  { %v10_v0 = vstv %s2479_s4 }
   0x2   :  { %11 = vst [vmem:[#allocation2] sm:$0x1] %v10_v0 }
   0x3   :  { %12 = vsyncpa [#allocation4], 0 }
   0x4   :  { %14 = vsyncpa [#allocation4 + $0x1], 0  ;;  %s1605_s20 = smov 0   ;;  %s1607_s21 = smov 0  }
   0x5   :  { %s1609_s22 = smov 0   ;;  %s1611_s23 = smov 0  }
   0x6   :  { %s1613_s24 = smov 0   ;;  %s1615_s25 = smov 0  }
   0x7 LB: > { %s1368_s4 = sadd.s32 4294967295, %s1569_s25   ;;  %s1369_s26 = sadd.s32 4294967294, %s1569_s25   ;;  %s1569_s25 = sphi %s1615_s25, %s20_s25   ;;  %s1565_s24 = sphi %s1613_s24, %s2487_s24   ;;  %s1561_s23 = sphi %s1611_s23, %s2486_s23   ;;  %s1557_s22 = sphi %s1609_s22, %s2485_s22   ;;  %s1553_s21 = sphi %s1607_s21, %s2484_s21   ;;  %s1549_s20 = sphi %s1605_s20, %s2483_s20  }
   0x8   : > { %s32_s27 = sadd.s32 1, %s1565_s24  ;;  %s158_s28 = sadd.s32 1, %s1557_s22 }
   0x9   : > { %p34_p0 = scmp.ge.s32.totalorder %s32_s27, 2  ;;  %p168_p1 = scmp.ne.s32.totalorder %s1557_s22, %s1553_s21 }
   0xa   : > { %p169_p2 = scmp.eq.s32.totalorder %s1368_s4, 1  ;;  %p174_p3 = scmp.ne.s32.totalorder %s1553_s21, %s1549_s20 }
   0xb   : > { %s2489_s27 = smov (%p34_p0, %s32_s27), 0  ;;  %p175_p5 = scmp.eq.s32.totalorder %s1369_s26, 1 }
   0xc   : > { %p1645_p4 = por %p169_p2, %p168_p1  ;;  %s153_s30 = ssub.s32 %s1565_s24, %s2489_s27 }
   0xd   : > { %p1372_p6 = scmp.ge.s32.totalorder %s1569_s25, 1  ;;  %p156_p7 = scmp.eq.s32.totalorder %s153_s30, 0 }
   0xe   : > { %p1652_p8 = por %p175_p5, %p174_p3  ;;  %p223_p9 = scmp.lt.s32.totalorder %s1569_s25, 3 }
   0xf   : > { %s1658_s7 = scalar_select %p156_p7, %s1557_s22, %s158_s28  }
  0x10   : > { %p224_p10 = pnand %p1372_p6, %p223_p9 }
  0x11   : > { %p261_p11 = scmp.lt.s32.totalorder (!%p224_p10), %s1561_s23, 1  ;;  %s257_s18 = sand.u32 (!%p224_p10), 1, %s1553_s21  }
  0x12   : > { %227 = sbr.rel (%p224_p10) target bundleno = 417 (0x1a1), region = 40  ;;  %s1511_s14 = scalar_lea.hbm (!%p224_p10), %s2480_s5, 4 }
  0x17   : > { %v297_v1 = vld [vmem:[%s2477_s2 + $0x20] sm:$0xff]  ;;  %v295_v2 = vld [vmem:[%s2477_s2 + $0x10] sm:$0xff]  ;;  %v1571_v4 = vmov 0   ;;  %v298_v5 = vld [vmem:[%s2477_s2 + $0x28] sm:$0xff]  ;;  %s1698_s16 = scalar_select %p261_p11, %s1561_s23, 1  ;;  %vm1255_vm0 = vcmask 1040384  }
  0x18   : > { %v293_v3 = vld [vmem:[%s2477_s2] sm:$0xff]  ;;  %1490 = vset.pattern.permute.xlu2 %v1571_v4  ;;  %1489 = vset.pattern.permute.xlu1 %v1571_v4  ;;  %v296_v6 = vld [vmem:[%s2477_s2 + $0x18] sm:$0xff]  ;;  %v294_v7 = vld [vmem:[%s2477_s2 + $0x8] sm:$0xff] }
  0x19   : > { %1488 = vset.pattern.permute.xlu0 %v1571_v4  ;;  %331 = vperm.xlu2 %1490, %v297_v1   ;;  %v301_v8 = vld [vmem:[%s2477_s2 + $0x40] sm:$0xff]  ;;  %v300_v9 = vld [vmem:[%s2477_s2 + $0x38] sm:$0xff]  ;;  %v299_v10 = vld [vmem:[%s2477_s2 + $0x30] sm:$0xff]  ;;  %s1431_s30 = sshll.u32 %s1698_s16, 7  ;;  %s1430_s13 = sshll.u32 %s1698_s16, 3 }
  0x1a   : > { %321 = vperm.xlu1 %1489, %v295_v2   ;;  %311 = vperm.xlu0 %1488, %v293_v3   ;;  %v304_v11 = vld [vmem:[%s2477_s2 + $0x58] sm:$0xff]  ;;  %v303_v12 = vld [vmem:[%s2477_s2 + $0x50] sm:$0xff]  ;;  %v302_v13 = vld [vmem:[%s2477_s2 + $0x48] sm:$0xff]  ;;  %s1713_s10 = scalar_lea.vmem %s2476_s1, %s1431_s30  ;;  %s268_s19 = scalar_lea.vmem %s2475_s0, %s1430_s13 }
  0x1b   : > { %v307_v14 = vld [vmem:[%s2477_s2 + $0x70] sm:$0xff]  ;;  %v306_v15 = vld [vmem:[%s2477_s2 + $0x68] sm:$0xff]  ;;  %v305_v16 = vld [vmem:[%s2477_s2 + $0x60] sm:$0xff]  ;;  %s1427_s16 = sshll.u32 %s1561_s23, 1  ;;  %s1264_s23 = scalar_lea.sflag [#allocation4], %s257_s18 }
  0x1c   : > { %v278_v17 = vld [vmem:[%s1713_s10 + $0x8] sm:$0xff]  ;;  %v308_v18 = vld [vmem:[%s2477_s2 + $0x78] sm:$0xff]  ;;  %v277_v19 = vld [vmem:[%s1713_s10] sm:$0xff]  ;;  %s1276_s28 = scalar_lea.hbm %s2480_s5, %s1427_s16 }
  0x1d   : > { %v281_v20 = vld [vmem:[%s1713_s10 + $0x20] sm:$0xff]  ;;  %v279_v21 = vld [vmem:[%s1713_s10 + $0x10] sm:$0xff]  ;;  %v280_v22 = vld [vmem:[%s1713_s10 + $0x18] sm:$0xff]  ;;  %s1280_s9 = sshll.u32 %s1276_s28, 4  ;;  %s1281_s9 = int_to_ptr.hbm [resolvable:$true] %s1280_s9 }
  0x1e   : > { %v284_v23 = vld [vmem:[%s1713_s10 + $0x38] sm:$0xff]  ;;  %v282_v24 = vld [vmem:[%s1713_s10 + $0x28] sm:$0xff]  ;;  %v283_v25 = vld [vmem:[%s1713_s10 + $0x30] sm:$0xff] }
  0x1f   : > { %v287_v26 = vld [vmem:[%s1713_s10 + $0x50] sm:$0xff]  ;;  %v285_v27 = vld [vmem:[%s1713_s10 + $0x40] sm:$0xff]  ;;  %v286_v28 = vld [vmem:[%s1713_s10 + $0x48] sm:$0xff] }
  0x20   : > { %v290_v29 = vld [vmem:[%s1713_s10 + $0x68] sm:$0xff]  ;;  %v288_v30 = vld [vmem:[%s1713_s10 + $0x58] sm:$0xff]  ;;  %v289_v31 = vld [vmem:[%s1713_s10 + $0x60] sm:$0xff] }
  0x21   : > { %336 = vperm.xlu2 %1490, %v298_v5   ;;  %v1378_v32 = vld [vmem:[%s2477_s2 + $0x80] sm:$0xff]  ;;  %v291_v33 = vld [vmem:[%s1713_s10 + $0x70] sm:$0xff]  ;;  %v292_v34 = vld [vmem:[%s1713_s10 + $0x78] sm:$0xff]  ;;  %s1505_s10 = sshra.s32 %s1281_s9, 4  ;;  %s1506_s10 = int_to_ptr.hbm [resolvable:$true] %s1505_s10 }
  0x22   : > { %326 = vperm.xlu1 %1489, %v296_v6   ;;  %316 = vperm.xlu0 %1488, %v294_v7   ;;  %v1741_v35 = vld [vmem:[%s268_s19] sm:$0xff]  ;;  %v1381_v38 = vld [vmem:[%s2477_s2 + $0x98] sm:$0xff]  ;;  %v1379_v39 = vld [vmem:[%s2477_s2 + $0x88] sm:$0xff]  ;;  %s1373_s19 = sshll.u32 %s257_s18, 1  ;;  %s1507_s11 = scalar_lea.hbm %s1506_s10, 2 }
  0x23   : > { %v390_v36 = vperm.slane %v1741_v35, 0  ;;  %v391_v37 = vperm.slane %v1741_v35, 4  ;;  %v1380_v40 = vld [vmem:[%s2477_s2 + $0x90] sm:$0xff]  ;;  %v1382_v47 = vld [vmem:[%s2477_s2 + $0xa0] sm:$0xff]  ;;  %v1383_v48 = vld [vmem:[%s2477_s2 + $0xa8] sm:$0xff]  ;;  %s259_s30 = scalar_lea.vmem [#allocation3], %s1373_s19  ;;  %p1508_p12 = scmp.ne.s32.totalorder %s1506_s10, %s1507_s11 }
  0x24   : > { %v1384_v46 = vld [vmem:[%s2477_s2 + $0xb0] sm:$0xff]  ;;  %v1387_v52 = vld [vmem:[%s2477_s2 + $0xc8] sm:$0xff]  ;;  %v1385_v53 = vld [vmem:[%s2477_s2 + $0xb8] sm:$0xff]  ;;  %s1278_s8 = sshll.u32 %s259_s30, 4  ;;  %p1512_p1 = scmp.lt.s32.totalorder %s1506_s10, %s2480_s5  ;;  %s1279_s8 = int_to_ptr.vmem [resolvable:$true] %s1278_s8 }
  0x25   : > { %v1754_v41 = vperm.slane %v390_v36, 0  ;;  %v1756_v42 = vperm.slane %v391_v37, 0  ;;  %v1386_v54 = vld [vmem:[%s2477_s2 + $0xc0] sm:$0xff]  ;;  %v1388_v59 = vld [vmem:[%s2477_s2 + $0xd0] sm:$0xff]  ;;  %v1389_v60 = vld [vmem:[%s2477_s2 + $0xd8] sm:$0xff]  ;;  %p1509_p13 = pnand %p1508_p12, %p1645_p4  ;;  %p1513_p2 = scmp.lt.s32.totalorder %s1511_s14, %s1507_s11 }
  0x26   : > { %v1390_v58 = vld [vmem:[%s2477_s2 + $0xe0] sm:$0xff]  ;;  %v1393_v6 = vld [vmem:[%s2477_s2 + $0xf8] sm:$0xff]  ;;  %v1391_v7 = vld [vmem:[%s2477_s2 + $0xe8] sm:$0xff] }
  0x27   : > { %p1510_p0 = pneg %p1509_p13  ;;  %p1514_p3 = por %p1513_p2, %p1512_p1 }
  0x29   : > { %351 = vperm.xlu2 %1490, %v301_v8   ;;  %v1392_v8 = vld [vmem:[%s2477_s2 + $0xf0] sm:$0xff]  ;;  %p1515_p5 = pnand %p1514_p3, %p1510_p0 }
  0x2a   : > { %346 = vperm.xlu1 %1489, %v300_v9   ;;  %341 = vperm.xlu0 %1488, %v299_v10  }
  0x31   : > { %366 = vperm.xlu2 %1490, %v304_v11  }
  0x32   : > { %361 = vperm.xlu1 %1489, %v303_v12   ;;  %356 = vperm.xlu0 %1488, %v302_v13  }
  0x39   : > { %381 = vperm.xlu2 %1490, %v307_v14  }
  0x3a   : > { %376 = vperm.xlu1 %1489, %v306_v15   ;;  %371 = vperm.xlu0 %1488, %v305_v16  }
  0x41   : > { %435 = vperm.xlu2 %1490, %v278_v17  }
  0x42   : > { %386 = vperm.xlu0 %1488, %v308_v18   ;;  %430 = vperm.xlu1 %1489, %v277_v19   ;;  %v1396_v18 = vld [vmem:[%s2477_s2 + $0x110] sm:$0xff]  ;;  %v1394_v19 = vld [vmem:[%s2477_s2 + $0x100] sm:$0xff] }
  0x49   : > { %450 = vperm.xlu2 %1490, %v281_v20   ;;  %v1395_v20 = vld [vmem:[%s2477_s2 + $0x108] sm:$0xff] }
  0x4a   : > { %440 = vperm.xlu0 %1488, %v279_v21   ;;  %445 = vperm.xlu1 %1489, %v280_v22  }
  0x51   : > { %465 = vperm.xlu2 %1490, %v284_v23  }
  0x52   : > { %455 = vperm.xlu0 %1488, %v282_v24   ;;  %460 = vperm.xlu1 %1489, %v283_v25  }
  0x59   : > { %480 = vperm.xlu2 %1490, %v287_v26  }
  0x5a   : > { %470 = vperm.xlu0 %1488, %v285_v27   ;;  %475 = vperm.xlu1 %1489, %v286_v28  }
  0x61   : > { %495 = vperm.xlu2 %1490, %v290_v29  }
  0x62   : > { %485 = vperm.xlu0 %1488, %v288_v30   ;;  %490 = vperm.xlu1 %1489, %v289_v31   ;;  %v1399_v30 = vld [vmem:[%s2477_s2 + $0x128] sm:$0xff]  ;;  %v1397_v31 = vld [vmem:[%s2477_s2 + $0x118] sm:$0xff] }
  0x69   : > { %559 = vperm.xlu2 %1490, %v1378_v32   ;;  %v1398_v32 = vld [vmem:[%s2477_s2 + $0x120] sm:$0xff] }
  0x6a   : > { %500 = vperm.xlu0 %1488, %v291_v33   ;;  %505 = vperm.xlu1 %1489, %v292_v34  }
  0x71   : > { %574 = vperm.xlu2 %1490, %v1381_v38  }
  0x72   : > { %564 = vperm.xlu0 %1488, %v1379_v39   ;;  %569 = vperm.xlu1 %1489, %v1380_v40  }
  0x73   : > { %v332_v43 = vpop.permute.xlu2 %331 }
  0x74   : > { %v1759_v44 = vmul.f32 %v1754_v41, %v332_v43  ;;  %v1762_v45 = vmul.f32 %v1756_v42, %v332_v43 }
  0x79   : > { %589 = vperm.xlu2 %1490, %v1384_v46  }
  0x7a   : > { %579 = vperm.xlu0 %1488, %v1382_v47   ;;  %584 = vperm.xlu1 %1489, %v1383_v48   ;;  %v1402_v47 = vld [vmem:[%s2477_s2 + $0x140] sm:$0xff] }
  0x7b   : > { %v337_v49 = vpop.permute.xlu2 %336 }
  0x7c   : > { %v1774_v50 = vmul.f32 %v1754_v41, %v337_v49  ;;  %v1777_v51 = vmul.f32 %v1756_v42, %v337_v49 }
  0x81   : > { %604 = vperm.xlu2 %1490, %v1387_v52  }
  0x82   : > { %594 = vperm.xlu0 %1488, %v1385_v53   ;;  %599 = vperm.xlu1 %1489, %v1386_v54  }
  0x83   : > { %v352_v55 = vpop.permute.xlu2 %351 }
  0x84   : > { %v1789_v56 = vmul.f32 %v1754_v41, %v352_v55  ;;  %v1792_v57 = vmul.f32 %v1756_v42, %v352_v55 }
  0x89   : > { %619 = vperm.xlu2 %1490, %v1390_v58  }
  0x8a   : > { %609 = vperm.xlu0 %1488, %v1388_v59   ;;  %614 = vperm.xlu1 %1489, %v1389_v60  }
  0x8b   : > { %v367_v61 = vpop.permute.xlu2 %366 }
  0x8c   : > { %v1804_v62 = vmul.f32 %v1754_v41, %v367_v61  ;;  %v1807_v63 = vmul.f32 %v1756_v42, %v367_v61  ;;  %v322_v0 = vpop.permute.xlu1 %321  ;;  %v312_v1 = vpop.permute.xlu0 %311  ;;  %v1405_v61 = vld [vmem:[%s2477_s2 + $0x158] sm:$0xff] }
  0x8d   : > { %v1810_v2 = vmul.f32 %v1754_v41, %v322_v0  ;;  %v1813_v3 = vmul.f32 %v1756_v42, %v322_v0  ;;  %v1816_v4 = vmul.f32 %v1754_v41, %v312_v1  ;;  %v1819_v5 = vmul.f32 %v1756_v42, %v312_v1  ;;  %v1403_v0 = vld [vmem:[%s2477_s2 + $0x148] sm:$0xff]  ;;  %v1404_v1 = vld [vmem:[%s2477_s2 + $0x150] sm:$0xff] }
  0x91   : > { %634 = vperm.xlu2 %1490, %v1393_v6  }
  0x92   : > { %624 = vperm.xlu0 %1488, %v1391_v7   ;;  %629 = vperm.xlu1 %1489, %v1392_v8  }
  0x93   : > { %v382_v9 = vpop.permute.xlu2 %381 }
  0x94   : > { %v1831_v10 = vmul.f32 %v1754_v41, %v382_v9  ;;  %v1834_v11 = vmul.f32 %v1756_v42, %v382_v9  ;;  %v327_v12 = vpop.permute.xlu1 %326  ;;  %v317_v13 = vpop.permute.xlu0 %316 }
  0x95   : > { %v1837_v14 = vmul.f32 %v1754_v41, %v327_v12  ;;  %v1840_v15 = vmul.f32 %v1756_v42, %v327_v12  ;;  %v398_v16 = vmul.f32 %v1754_v41, %v317_v13  ;;  %v399_v17 = vmul.f32 %v1756_v42, %v317_v13 }
  0x99   : > { %736 = vperm.xlu2 %1490, %v1396_v18  }
  0x9a   : > { %726 = vperm.xlu0 %1488, %v1394_v19   ;;  %731 = vperm.xlu1 %1489, %v1395_v20   ;;  %v1408_v19 = vld [vmem:[%s2477_s2 + $0x170] sm:$0xff]  ;;  %v1406_v20 = vld [vmem:[%s2477_s2 + $0x160] sm:$0xff] }
  0x9b   : > { %v436_v21 = vpop.permute.xlu2 %435 }
  0x9c   : > { %v347_v22 = vpop.permute.xlu1 %346  ;;  %v342_v23 = vpop.permute.xlu0 %341  ;;  %v1853_v24 = vadd.f32 %v436_v21, %v398_v16  ;;  %v1855_v25 = vadd.f32 %v436_v21, %v399_v17 }
  0x9d   : > { %v410_v26 = vmul.f32 %v1754_v41, %v347_v22  ;;  %v411_v27 = vmul.f32 %v1756_v42, %v347_v22  ;;  %v1860_v28 = vmul.f32 %v1754_v41, %v342_v23  ;;  %v1863_v29 = vmul.f32 %v1756_v42, %v342_v23 }
  0xa1   : > { %751 = vperm.xlu2 %1490, %v1399_v30  }
  0xa2   : > { %741 = vperm.xlu0 %1488, %v1397_v31   ;;  %746 = vperm.xlu1 %1489, %v1398_v32  }
  0xa3   : > { %v451_v33 = vpop.permute.xlu2 %450 }
  0xa4   : > { %v362_v34 = vpop.permute.xlu1 %361  ;;  %v357_v36 = vpop.permute.xlu0 %356  ;;  %v1875_v37 = vadd.f32 %v451_v33, %v1759_v44  ;;  %v1878_v38 = vadd.f32 %v451_v33, %v1762_v45  ;;  %v1400_v44 = vld [vmem:[%s2477_s2 + $0x130] sm:$0xff]  ;;  %v1401_v45 = vld [vmem:[%s2477_s2 + $0x138] sm:$0xff]  ;;  %v1411_v33 = vld [vmem:[%s2477_s2 + $0x188] sm:$0xff] }
  0xa5   : > { %v416_v39 = vmul.f32 %v1754_v41, %v362_v34  ;;  %v417_v40 = vmul.f32 %v1756_v42, %v362_v34  ;;  %v1883_v43 = vmul.f32 %v1754_v41, %v357_v36  ;;  %v1886_v46 = vmul.f32 %v1756_v42, %v357_v36  ;;  %v1409_v34 = vld [vmem:[%s2477_s2 + $0x178] sm:$0xff] }
  0xa9   : > { %766 = vperm.xlu2 %1490, %v1402_v47  }
  0xaa   : > { %756 = vperm.xlu0 %1488, %v1400_v44   ;;  %761 = vperm.xlu1 %1489, %v1401_v45  }
  0xab   : > { %v466_v48 = vpop.permute.xlu2 %465 }
  0xac   : > { %v377_v49 = vpop.permute.xlu1 %376  ;;  %v372_v52 = vpop.permute.xlu0 %371  ;;  %v1897_v53 = vadd.f32 %v466_v48, %v410_v26  ;;  %v1899_v54 = vadd.f32 %v466_v48, %v411_v27 }
  0xad   : > { %v422_v55 = vmul.f32 %v1754_v41, %v377_v49  ;;  %v423_v58 = vmul.f32 %v1756_v42, %v377_v49  ;;  %v1904_v59 = vmul.f32 %v1754_v41, %v372_v52  ;;  %v1907_v60 = vmul.f32 %v1756_v42, %v372_v52 }
  0xb1   : > { %781 = vperm.xlu2 %1490, %v1405_v61  }
  0xb2   : > { %771 = vperm.xlu0 %1488, %v1403_v0   ;;  %776 = vperm.xlu1 %1489, %v1404_v1  }
  0xb3   : > { %v481_v6 = vpop.permute.xlu2 %480 }
  0xb4   : > { %v387_v7 = vpop.permute.xlu0 %386  ;;  %v1918_v8 = vadd.f32 %v481_v6, %v416_v39  ;;  %v1920_v9 = vadd.f32 %v481_v6, %v417_v40  ;;  %v431_v12 = vpop.permute.xlu1 %430 }
  0xb5   : > { %v1923_v13 = vmul.f32 %v1754_v41, %v387_v7  ;;  %v1926_v16 = vmul.f32 %v1756_v42, %v387_v7  ;;  %v508_v17 = vadd.f32 %v431_v12, %v1816_v4  ;;  %v509_v18 = vadd.f32 %v431_v12, %v1819_v5  ;;  %v1407_v41 = vld [vmem:[%s2477_s2 + $0x168] sm:$0xff] }
  0xb6   : > { %v637_v4 = vperm.slane %v1741_v35, 1  ;;  %v638_v5 = vperm.slane %v1741_v35, 5 }
  0xb8   : > { %v1962_v36 = vperm.slane %v637_v4, 1 }
  0xb9   : > { %796 = vperm.xlu2 %1490, %v1408_v19  }
  0xba   : > { %786 = vperm.xlu0 %1488, %v1406_v20   ;;  %791 = vperm.xlu1 %1489, %v1407_v41   ;;  %v1417_v20 = vld [vmem:[%s2477_s2 + $0x1b8] sm:$0xff] }
  0xbb   : > { %v496_v42 = vpop.permute.xlu2 %495 }
  0xbc   : > { %v441_v21 = vpop.permute.xlu0 %440  ;;  %v1941_v22 = vadd.f32 %v496_v42, %v422_v55  ;;  %v1943_v23 = vadd.f32 %v496_v42, %v423_v58  ;;  %v446_v26 = vpop.permute.xlu1 %445  ;;  %v1414_v58 = vld [vmem:[%s2477_s2 + $0x1a0] sm:$0xff] }
  0xbd   : > { %v1946_v27 = vadd.f32 %v441_v21, %v1810_v2  ;;  %v1949_v30 = vadd.f32 %v441_v21, %v1813_v3  ;;  %v514_v31 = vadd.f32 %v446_v26, %v1837_v14  ;;  %v515_v32 = vadd.f32 %v446_v26, %v1840_v15  ;;  %v1410_v2 = vld [vmem:[%s2477_s2 + $0x180] sm:$0xff] }
  0xbe   : > { %v1964_v3 = vperm.slane %v638_v5, 1 }
  0xc1   : > { %898 = vperm.xlu2 %1490, %v1411_v33  }
  0xc2   : > { %801 = vperm.xlu0 %1488, %v1409_v34   ;;  %893 = vperm.xlu1 %1489, %v1410_v2   ;;  %v1420_v34 = vld [vmem:[%s2477_s2 + $0x1d0] sm:$0xff] }
  0xc3   : > { %v560_v14 = vpop.permute.xlu2 %559 }
  0xc4   : > { %v456_v15 = vpop.permute.xlu0 %455  ;;  %v643_v39 = vmul.f32 %v1962_v36, %v560_v14  ;;  %v644_v40 = vmul.f32 %v1964_v3, %v560_v14  ;;  %v461_v47 = vpop.permute.xlu1 %460 }
  0xc5   : > { %v1969_v44 = vadd.f32 %v456_v15, %v1774_v50  ;;  %v1972_v45 = vadd.f32 %v456_v15, %v1777_v51  ;;  %v520_v48 = vadd.f32 %v461_v47, %v1860_v28  ;;  %v521_v49 = vadd.f32 %v461_v47, %v1863_v29  ;;  %v1412_v50 = vld [vmem:[%s2477_s2 + $0x190] sm:$0xff]  ;;  %v1413_v51 = vld [vmem:[%s2477_s2 + $0x198] sm:$0xff] }
  0xc6   : > { %v1976_v52 = vadd.f32 %v643_v39, %v508_v17  ;;  %v1978_v55 = vadd.f32 %v644_v40, %v509_v18 }
  0xc9   : > { %913 = vperm.xlu2 %1490, %v1414_v58  }
  0xca   : > { %903 = vperm.xlu0 %1488, %v1412_v50   ;;  %908 = vperm.xlu1 %1489, %v1413_v51   ;;  %v1423_v50 = vld [vmem:[%s2477_s2 + $0x1e8] sm:$0xff] }
  0xcb   : > { %v575_v28 = vpop.permute.xlu2 %574 }
  0xcc   : > { %v471_v29 = vpop.permute.xlu0 %470  ;;  %v649_v61 = vmul.f32 %v1962_v36, %v575_v28  ;;  %v650_v0 = vmul.f32 %v1964_v3, %v575_v28  ;;  %v476_v1 = vpop.permute.xlu1 %475 }
  0xcd   : > { %v1992_v6 = vadd.f32 %v471_v29, %v1789_v56  ;;  %v1995_v7 = vadd.f32 %v471_v29, %v1792_v57  ;;  %v526_v12 = vadd.f32 %v476_v1, %v1883_v43  ;;  %v527_v17 = vadd.f32 %v476_v1, %v1886_v46  ;;  %v1415_v56 = vld [vmem:[%s2477_s2 + $0x1a8] sm:$0xff]  ;;  %v1416_v57 = vld [vmem:[%s2477_s2 + $0x1b0] sm:$0xff] }
  0xce   : > { %v1999_v18 = vadd.f32 %v649_v61, %v514_v31  ;;  %v2001_v19 = vadd.f32 %v650_v0, %v515_v32 }
  0xd1   : > { %928 = vperm.xlu2 %1490, %v1417_v20  }
  0xd2   : > { %918 = vperm.xlu0 %1488, %v1415_v56   ;;  %923 = vperm.xlu1 %1489, %v1416_v57   ;;  %v1073_v56 = vld [vmem:[%s2478_s3] sm:$0xff] }
  0xd3   : > { %v590_v43 = vpop.permute.xlu2 %589 }
  0xd4   : > { %v486_v46 = vpop.permute.xlu0 %485  ;;  %v655_v41 = vmul.f32 %v1962_v36, %v590_v43  ;;  %v656_v42 = vmul.f32 %v1964_v3, %v590_v43  ;;  %v491_v4 = vpop.permute.xlu1 %490 }
  0xd5   : > { %v2015_v5 = vadd.f32 %v486_v46, %v1804_v62  ;;  %v2018_v21 = vadd.f32 %v486_v46, %v1807_v63  ;;  %v532_v26 = vadd.f32 %v491_v4, %v1904_v59  ;;  %v533_v31 = vadd.f32 %v491_v4, %v1907_v60  ;;  %v1418_v62 = vld [vmem:[%s2477_s2 + $0x1c0] sm:$0xff]  ;;  %v1419_v63 = vld [vmem:[%s2477_s2 + $0x1c8] sm:$0xff]  ;;  %v1425_v4 = vld [vmem:[%s2477_s2 + $0x1f8] sm:$0xff] }
  0xd6   : > { %v2022_v32 = vadd.f32 %v655_v41, %v520_v48  ;;  %v2024_v33 = vadd.f32 %v656_v42, %v521_v49  ;;  %v1424_v42 = vld [vmem:[%s2477_s2 + $0x1f0] sm:$0xff] }
  0xd9   : > { %943 = vperm.xlu2 %1490, %v1420_v34  }
  0xda   : > { %933 = vperm.xlu0 %1488, %v1418_v62   ;;  %938 = vperm.xlu1 %1489, %v1419_v63  }
  0xdb   : > { %v605_v59 = vpop.permute.xlu2 %604 }
  0xdc   : > { %v501_v60 = vpop.permute.xlu0 %500  ;;  %v661_v2 = vmul.f32 %v1962_v36, %v605_v59  ;;  %v662_v14 = vmul.f32 %v1964_v3, %v605_v59  ;;  %v506_v15 = vpop.permute.xlu1 %505 }
  0xdd   : > { %v2038_v39 = vadd.f32 %v501_v60, %v1831_v10  ;;  %v2041_v40 = vadd.f32 %v501_v60, %v1834_v11  ;;  %v538_v47 = vadd.f32 %v506_v15, %v1923_v13  ;;  %v539_v48 = vadd.f32 %v506_v15, %v1926_v16  ;;  %v1421_v10 = vld [vmem:[%s2477_s2 + $0x1d8] sm:$0xff]  ;;  %v1422_v11 = vld [vmem:[%s2477_s2 + $0x1e0] sm:$0xff] }
  0xde   : > { %v2045_v49 = vadd.f32 %v661_v2, %v526_v12  ;;  %v2047_v58 = vadd.f32 %v662_v14, %v527_v17  ;;  %v1076_v15 = vld [vmem:[%s2478_s3 + $0x18] sm:$0xff] }
  0xe1   : > { %958 = vperm.xlu2 %1490, %v1423_v50  }
  0xe2   : > { %948 = vperm.xlu0 %1488, %v1421_v10   ;;  %953 = vperm.xlu1 %1489, %v1422_v11  }
  0xe3   : > { %v620_v13 = vpop.permute.xlu2 %619 }
  0xe4   : > { %v565_v16 = vpop.permute.xlu0 %564  ;;  %v667_v51 = vmul.f32 %v1962_v36, %v620_v13  ;;  %v668_v28 = vmul.f32 %v1964_v3, %v620_v13  ;;  %v570_v29 = vpop.permute.xlu1 %569 }
  0xe5   : > { %v645_v61 = vmul.f32 %v1962_v36, %v565_v16  ;;  %v646_v0 = vmul.f32 %v1964_v3, %v565_v16  ;;  %v647_v1 = vmul.f32 %v1962_v36, %v570_v29  ;;  %v648_v12 = vmul.f32 %v1964_v3, %v570_v29 }
  0xe6   : > { %v2064_v17 = vadd.f32 %v667_v51, %v532_v26  ;;  %v2066_v20 = vadd.f32 %v668_v28, %v533_v31  ;;  %v804_v26 = vperm.slane %v1741_v35, 2 }
  0xe7   : > { %v2072_v57 = vadd.f32 %v645_v61, %v1853_v24  ;;  %v2075_v43 = vadd.f32 %v646_v0, %v1855_v25  ;;  %v679_v46 = vadd.f32 %v647_v1, %v1946_v27  ;;  %v680_v41 = vadd.f32 %v648_v12, %v1949_v30 }
  0xe8   : > { %v805_v25 = vperm.slane %v1741_v35, 6  ;;  %v2114_v16 = vperm.slane %v804_v26, 2 }
  0xe9   : > { %1091 = vperm.xlu2 %1490, %v1073_v56  }
  0xea   : > { %963 = vperm.xlu0 %1488, %v1424_v42   ;;  %968 = vperm.xlu1 %1489, %v1425_v4   ;;  %v2116_v51 = vperm.slane %v805_v25, 2  ;;  %v1079_v42 = vld [vmem:[%s2478_s3 + $0x30] sm:$0xff] }
  0xeb   : > { %v635_v24 = vpop.permute.xlu2 %634 }
  0xec   : > { %v580_v31 = vpop.permute.xlu0 %579  ;;  %v673_v27 = vmul.f32 %v1962_v36, %v635_v24  ;;  %v674_v30 = vmul.f32 %v1964_v3, %v635_v24  ;;  %v585_v34 = vpop.permute.xlu1 %584 }
  0xed   : > { %v651_v62 = vmul.f32 %v1962_v36, %v580_v31  ;;  %v652_v63 = vmul.f32 %v1964_v3, %v580_v31  ;;  %v653_v59 = vmul.f32 %v1962_v36, %v585_v34  ;;  %v654_v60 = vmul.f32 %v1964_v3, %v585_v34 }
  0xee   : > { %v2093_v2 = vadd.f32 %v673_v27, %v538_v47  ;;  %v2095_v14 = vadd.f32 %v674_v30, %v539_v48  ;;  %v1074_v47 = vld [vmem:[%s2478_s3 + $0x8] sm:$0xff]  ;;  %v1075_v48 = vld [vmem:[%s2478_s3 + $0x10] sm:$0xff] }
  0xef   : > { %v2101_v50 = vadd.f32 %v651_v62, %v1875_v37  ;;  %v2104_v10 = vadd.f32 %v652_v63, %v1878_v38  ;;  %v685_v11 = vadd.f32 %v653_v59, %v1969_v44  ;;  %v686_v13 = vadd.f32 %v654_v60, %v1972_v45  ;;  %v1082_v60 = vld [vmem:[%s2478_s3 + $0x48] sm:$0xff] }
  0xf1   : > { %1106 = vperm.xlu2 %1490, %v1076_v15  }
  0xf2   : > { %1096 = vperm.xlu0 %1488, %v1074_v47   ;;  %1101 = vperm.xlu1 %1489, %v1075_v48  }
  0xf3   : > { %v737_v37 = vpop.permute.xlu2 %736 }
  0xf4   : > { %v595_v38 = vpop.permute.xlu0 %594  ;;  %v814_v44 = vmul.f32 %v2114_v16, %v737_v37  ;;  %v815_v45 = vmul.f32 %v2116_v51, %v737_v37  ;;  %v600_v28 = vpop.permute.xlu1 %599 }
  0xf5   : > { %v657_v29 = vmul.f32 %v1962_v36, %v595_v38  ;;  %v658_v61 = vmul.f32 %v1964_v3, %v595_v38  ;;  %v659_v0 = vmul.f32 %v1962_v36, %v600_v28  ;;  %v660_v1 = vmul.f32 %v1964_v3, %v600_v28 }
  0xf6   : > { %v2124_v12 = vadd.f32 %v814_v44, %v679_v46  ;;  %v2126_v56 = vadd.f32 %v815_v45, %v680_v41  ;;  %v1077_v46 = vld [vmem:[%s2478_s3 + $0x20] sm:$0xff]  ;;  %v1078_v41 = vld [vmem:[%s2478_s3 + $0x28] sm:$0xff] }
  0xf7   : > { %v2132_v4 = vadd.f32 %v657_v29, %v1897_v53  ;;  %v2135_v24 = vadd.f32 %v658_v61, %v1899_v54  ;;  %v691_v26 = vadd.f32 %v659_v0, %v1992_v6  ;;  %v692_v25 = vadd.f32 %v660_v1, %v1995_v7  ;;  %v1085_v1 = vld [vmem:[%s2478_s3 + $0x60] sm:$0xff] }
  0xf9   : > { %1121 = vperm.xlu2 %1490, %v1079_v42  }
  0xfa   : > { %1111 = vperm.xlu0 %1488, %v1077_v46   ;;  %1116 = vperm.xlu1 %1489, %v1078_v41  }
  0xfb   : > { %v752_v53 = vpop.permute.xlu2 %751 }
  0xfc   : > { %v610_v31 = vpop.permute.xlu0 %609  ;;  %v820_v54 = vmul.f32 %v2114_v16, %v752_v53  ;;  %v821_v27 = vmul.f32 %v2116_v51, %v752_v53  ;;  %v615_v6 = vpop.permute.xlu1 %614 }
  0xfd   : > { %v663_v7 = vmul.f32 %v1962_v36, %v610_v31  ;;  %v664_v30 = vmul.f32 %v1964_v3, %v610_v31  ;;  %v665_v34 = vmul.f32 %v1962_v36, %v615_v6  ;;  %v666_v62 = vmul.f32 %v1964_v3, %v615_v6 }
  0xfe   : > { %v2151_v63 = vadd.f32 %v820_v54, %v685_v11  ;;  %v2153_v59 = vadd.f32 %v821_v27, %v686_v13  ;;  %v1080_v11 = vld [vmem:[%s2478_s3 + $0x38] sm:$0xff]  ;;  %v1081_v13 = vld [vmem:[%s2478_s3 + $0x40] sm:$0xff] }
  0xff   : > { %v2159_v15 = vadd.f32 %v663_v7, %v1918_v8  ;;  %v2162_v47 = vadd.f32 %v664_v30, %v1920_v9  ;;  %v697_v48 = vadd.f32 %v665_v34, %v2015_v5  ;;  %v698_v37 = vadd.f32 %v666_v62, %v2018_v21  ;;  %v1088_v30 = vld [vmem:[%s2478_s3 + $0x78] sm:$0xff] }
 0x101   : > { %1136 = vperm.xlu2 %1490, %v1082_v60  }
 0x102   : > { %1126 = vperm.xlu0 %1488, %v1080_v11   ;;  %1131 = vperm.xlu1 %1489, %v1081_v13   ;;  %v971_v13 = vperm.slane %v1741_v35, 3 }
 0x103   : > { %v767_v8 = vpop.permute.xlu2 %766 }
 0x104   : > { %v625_v38 = vpop.permute.xlu0 %624  ;;  %v826_v9 = vmul.f32 %v2114_v16, %v767_v8  ;;  %v827_v44 = vmul.f32 %v2116_v51, %v767_v8  ;;  %v630_v5 = vpop.permute.xlu1 %629 }
 0x105   : > { %v669_v21 = vmul.f32 %v1962_v36, %v625_v38  ;;  %v670_v45 = vmul.f32 %v1964_v3, %v625_v38  ;;  %v671_v28 = vmul.f32 %v1962_v36, %v630_v5  ;;  %v672_v29 = vmul.f32 %v1964_v3, %v630_v5  ;;  %v1083_v3 = vld [vmem:[%s2478_s3 + $0x50] sm:$0xff] }
 0x106   : > { %v2178_v61 = vadd.f32 %v826_v9, %v691_v26  ;;  %v2180_v0 = vadd.f32 %v827_v44, %v692_v25  ;;  %v1084_v26 = vld [vmem:[%s2478_s3 + $0x58] sm:$0xff] }
 0x107   : > { %v2186_v42 = vadd.f32 %v669_v21, %v1941_v22  ;;  %v2189_v46 = vadd.f32 %v670_v45, %v1943_v23  ;;  %v703_v41 = vadd.f32 %v671_v28, %v2038_v39  ;;  %v704_v36 = vadd.f32 %v672_v29, %v2041_v40 }
 0x109   : > { %1151 = vperm.xlu2 %1490, %v1085_v1  }
 0x10a   : > { %1141 = vperm.xlu0 %1488, %v1083_v3   ;;  %1146 = vperm.xlu1 %1489, %v1084_v26   ;;  %v1243_v26 = vld [vmem:[#allocation2] sm:$0x1] }
 0x10b   : > { %v782_v22 = vpop.permute.xlu2 %781 }
 0x10c   : > { %v727_v25 = vpop.permute.xlu0 %726  ;;  %v832_v23 = vmul.f32 %v2114_v16, %v782_v22  ;;  %v833_v53 = vmul.f32 %v2116_v51, %v782_v22  ;;  %v732_v39 = vpop.permute.xlu1 %731  ;;  %v2246_v22 = vperm.slane %v971_v13, 3 }
 0x10d   : > { %v810_v40 = vmul.f32 %v2114_v16, %v727_v25  ;;  %v811_v31 = vmul.f32 %v2116_v51, %v727_v25  ;;  %v812_v54 = vmul.f32 %v2114_v16, %v732_v39  ;;  %v813_v27 = vmul.f32 %v2116_v51, %v732_v39 }
 0x10e   : > { %v2205_v6 = vadd.f32 %v832_v23, %v697_v48  ;;  %v2207_v7 = vadd.f32 %v833_v53, %v698_v37  ;;  %v1086_v48 = vld [vmem:[%s2478_s3 + $0x68] sm:$0xff]  ;;  %v1087_v37 = vld [vmem:[%s2478_s3 + $0x70] sm:$0xff] }
 0x10f   : > { %v2213_v34 = vadd.f32 %v810_v40, %v1976_v52  ;;  %v2216_v62 = vadd.f32 %v811_v31, %v1978_v55  ;;  %v844_v60 = vadd.f32 %v812_v54, %v2072_v57  ;;  %v845_v11 = vadd.f32 %v813_v27, %v2075_v43 }
 0x110   : > { %v972_v55 = vperm.slane %v1741_v35, 7 }
 0x111   : > { %1166 = vperm.xlu2 %1490, %v1088_v30  }
 0x112   : > { %1156 = vperm.xlu0 %1488, %v1086_v48   ;;  %1161 = vperm.xlu1 %1489, %v1087_v37   ;;  %v2248_v25 = vperm.slane %v972_v55, 3 }
 0x113   : > { %v797_v52 = vpop.permute.xlu2 %796 }
 0x114   : > { %v742_v8 = vpop.permute.xlu0 %741  ;;  %v838_v57 = vmul.f32 %v2114_v16, %v797_v52  ;;  %v839_v43 = vmul.f32 %v2116_v51, %v797_v52  ;;  %v747_v38 = vpop.permute.xlu1 %746 }
 0x115   : > { %v816_v9 = vmul.f32 %v2114_v16, %v742_v8  ;;  %v817_v44 = vmul.f32 %v2116_v51, %v742_v8  ;;  %v818_v5 = vmul.f32 %v2114_v16, %v747_v38  ;;  %v819_v21 = vmul.f32 %v2116_v51, %v747_v38 }
 0x116   : > { %v2234_v45 = vadd.f32 %v838_v57, %v703_v41  ;;  %v2236_v28 = vadd.f32 %v839_v43, %v704_v36 }
 0x117   : > { %v2239_v35 = vadd.f32 %v816_v9, %v1999_v18  ;;  %v2242_v29 = vadd.f32 %v817_v44, %v2001_v19  ;;  %v850_v1 = vadd.f32 %v818_v5, %v2101_v50  ;;  %v851_v3 = vadd.f32 %v819_v21, %v2104_v10 }
 0x11a   : > { %1246 = vperm.xlu0 %1488, %v1243_v26  }
 0x11b   : > { %v899_v41 = vpop.permute.xlu2 %898 }
 0x11c   : > { %v757_v23 = vpop.permute.xlu0 %756  ;;  %v979_v36 = vmul.f32 %v2246_v22, %v899_v41  ;;  %v980_v18 = vmul.f32 %v2248_v25, %v899_v41  ;;  %v762_v53 = vpop.permute.xlu1 %761 }
 0x11d   : > { %v822_v19 = vmul.f32 %v2114_v16, %v757_v23  ;;  %v823_v39 = vmul.f32 %v2116_v51, %v757_v23  ;;  %v824_v50 = vmul.f32 %v2114_v16, %v762_v53  ;;  %v825_v10 = vmul.f32 %v2116_v51, %v762_v53 }
 0x11e   : > { %v2256_v40 = vadd.f32 %v979_v36, %v844_v60  ;;  %v2258_v31 = vadd.f32 %v980_v18, %v845_v11 }
 0x11f   : > { %v2261_v54 = vadd.f32 %v822_v19, %v2022_v32  ;;  %v2264_v27 = vadd.f32 %v823_v39, %v2024_v33  ;;  %v856_v30 = vadd.f32 %v824_v50, %v2132_v4  ;;  %v857_v48 = vadd.f32 %v825_v10, %v2135_v24 }
 0x123   : > { %v914_v37 = vpop.permute.xlu2 %913 }
 0x124   : > { %v772_v52 = vpop.permute.xlu0 %771  ;;  %v985_v13 = vmul.f32 %v2246_v22, %v914_v37  ;;  %v986_v55 = vmul.f32 %v2248_v25, %v914_v37  ;;  %v777_v60 = vpop.permute.xlu1 %776 }
 0x125   : > { %v828_v11 = vmul.f32 %v2114_v16, %v772_v52  ;;  %v829_v8 = vmul.f32 %v2116_v51, %v772_v52  ;;  %v830_v32 = vmul.f32 %v2114_v16, %v777_v60  ;;  %v831_v33 = vmul.f32 %v2116_v51, %v777_v60 }
 0x126   : > { %v2274_v57 = vadd.f32 %v985_v13, %v850_v1  ;;  %v2276_v4 = vadd.f32 %v986_v55, %v851_v3 }
 0x127   : > { %v2279_v24 = vadd.f32 %v828_v11, %v2045_v49  ;;  %v2282_v43 = vadd.f32 %v829_v8, %v2047_v58  ;;  %v862_v38 = vadd.f32 %v830_v32, %v2159_v15  ;;  %v863_v9 = vadd.f32 %v831_v33, %v2162_v47 }
 0x12b   : > { %v929_v44 = vpop.permute.xlu2 %928 }
 0x12c   : > { %v787_v5 = vpop.permute.xlu0 %786  ;;  %v991_v21 = vmul.f32 %v2246_v22, %v929_v44  ;;  %v992_v26 = vmul.f32 %v2248_v25, %v929_v44  ;;  %v792_v1 = vpop.permute.xlu1 %791 }
 0x12d   : > { %v834_v3 = vmul.f32 %v2114_v16, %v787_v5  ;;  %v835_v41 = vmul.f32 %v2116_v51, %v787_v5  ;;  %v836_v49 = vmul.f32 %v2114_v16, %v792_v1  ;;  %v837_v58 = vmul.f32 %v2116_v51, %v792_v1 }
 0x12e   : > { %v2292_v23 = vadd.f32 %v991_v21, %v856_v30  ;;  %v2294_v15 = vadd.f32 %v992_v26, %v857_v48 }
 0x12f   : > { %v2297_v47 = vadd.f32 %v834_v3, %v2064_v17  ;;  %v2300_v36 = vadd.f32 %v835_v41, %v2066_v20  ;;  %v868_v18 = vadd.f32 %v836_v49, %v2186_v42  ;;  %v869_v53 = vadd.f32 %v837_v58, %v2189_v46 }
 0x133   : > { %v944_v19 = vpop.permute.xlu2 %943 }
 0x134   : > { %v802_v39 = vpop.permute.xlu0 %801  ;;  %v997_v50 = vmul.f32 %v2246_v22, %v944_v19  ;;  %v998_v10 = vmul.f32 %v2248_v25, %v944_v19  ;;  %v894_v30 = vpop.permute.xlu1 %893 }
 0x135   : > { %v840_v48 = vmul.f32 %v2114_v16, %v802_v39  ;;  %v841_v37 = vmul.f32 %v2116_v51, %v802_v39  ;;  %v977_v17 = vmul.f32 %v2246_v22, %v894_v30  ;;  %v978_v20 = vmul.f32 %v2248_v25, %v894_v30 }
 0x136   : > { %v2310_v52 = vadd.f32 %v997_v50, %v862_v38  ;;  %v2312_v42 = vadd.f32 %v998_v10, %v863_v9 }
 0x137   : > { %v872_v46 = vadd.f32 %v840_v48, %v2093_v2  ;;  %v873_v13 = vadd.f32 %v841_v37, %v2095_v14  ;;  %v2317_v55 = vadd.f32 %v977_v17, %v2213_v34  ;;  %v2320_v60 = vadd.f32 %v978_v20, %v2216_v62 }
 0x13b   : > { %v959_v16 = vpop.permute.xlu2 %958 }
 0x13c   : > { %v904_v51 = vpop.permute.xlu0 %903  ;;  %v1003_v11 = vmul.f32 %v2246_v22, %v959_v16  ;;  %v1004_v8 = vmul.f32 %v2248_v25, %v959_v16  ;;  %v909_v32 = vpop.permute.xlu1 %908 }
 0x13d   : > { %v981_v33 = vmul.f32 %v2246_v22, %v904_v51  ;;  %v982_v38 = vmul.f32 %v2248_v25, %v904_v51  ;;  %v983_v2 = vmul.f32 %v2246_v22, %v909_v32  ;;  %v984_v14 = vmul.f32 %v2248_v25, %v909_v32 }
 0x13e   : > { %v2328_v34 = vadd.f32 %v1003_v11, %v868_v18  ;;  %v2330_v9 = vadd.f32 %v1004_v8, %v869_v53 }
 0x13f   : > { %v2333_v62 = vadd.f32 %v981_v33, %v2124_v12  ;;  %v2336_v44 = vadd.f32 %v982_v38, %v2126_v56  ;;  %v2339_v5 = vadd.f32 %v983_v2, %v2239_v35  ;;  %v2342_v21 = vadd.f32 %v984_v14, %v2242_v29 }
 0x143   : > { %v1092_v30 = vpop.permute.xlu2 %1091 }
 0x144   : > { %v919_v26 = vpop.permute.xlu0 %918  ;;  %v924_v1 = vpop.permute.xlu1 %923 }
 0x145   : > { %v987_v3 = vmul.f32 %v2246_v22, %v919_v26  ;;  %v988_v41 = vmul.f32 %v2248_v25, %v919_v26  ;;  %v989_v49 = vmul.f32 %v2246_v22, %v924_v1  ;;  %v990_v12 = vmul.f32 %v2248_v25, %v924_v1 }
 0x146   : > { %v1041_v26 = vmax.f32 %v2317_v55, 0.0  ;;  %v1042_v1 = vmax.f32 %v2320_v60, 0.0  ;;  %v1048_v55 = vmax.f32 %v2342_v21, 0.0 }
 0x147   : > { %v2349_v58 = vadd.f32 %v987_v3, %v2151_v63  ;;  %v2352_v56 = vadd.f32 %v988_v41, %v2153_v59  ;;  %v2355_v35 = vadd.f32 %v989_v49, %v2261_v54  ;;  %v2358_v29 = vadd.f32 %v990_v12, %v2264_v27 }
 0x148   : > { %v1043_v3 = vmax.f32 %v2256_v40, 0.0  ;;  %v1169_v49 = vmul.f32 %v1092_v30, %v1041_v26 }
 0x149   : > { %v1051_v21 = vmax.f32 %v2349_v58, 0.0 }
 0x14b   : > { %v1107_v32 = vpop.permute.xlu2 %1106 }
 0x14c   : > { %v934_v18 = vpop.permute.xlu0 %933  ;;  %v939_v53 = vpop.permute.xlu1 %938 }
 0x14d   : > { %v993_v19 = vmul.f32 %v2246_v22, %v934_v18  ;;  %v994_v39 = vmul.f32 %v2248_v25, %v934_v18  ;;  %v995_v50 = vmul.f32 %v2246_v22, %v939_v53  ;;  %v996_v63 = vmul.f32 %v2248_v25, %v939_v53 }
 0x14f   : > { %v2365_v10 = vadd.f32 %v993_v19, %v2178_v61  ;;  %v2368_v59 = vadd.f32 %v994_v39, %v2180_v0  ;;  %v2371_v54 = vadd.f32 %v995_v50, %v2279_v24  ;;  %v2374_v27 = vadd.f32 %v996_v63, %v2282_v43 }
 0x150   : > { %v1176_v50 = vmul.f32 %v1107_v32, %v1048_v55 }
 0x153   : > { %v1122_v53 = vpop.permute.xlu2 %1121 }
 0x154   : > { %v949_v48 = vpop.permute.xlu0 %948  ;;  %v954_v37 = vpop.permute.xlu1 %953 }
 0x155   : > { %v999_v17 = vmul.f32 %v2246_v22, %v949_v48  ;;  %v1000_v20 = vmul.f32 %v2248_v25, %v949_v48  ;;  %v1001_v16 = vmul.f32 %v2246_v22, %v954_v37  ;;  %v1002_v61 = vmul.f32 %v2248_v25, %v954_v37 }
 0x157   : > { %v2381_v0 = vadd.f32 %v999_v17, %v2205_v6  ;;  %v2384_v24 = vadd.f32 %v1000_v20, %v2207_v7  ;;  %v2387_v43 = vadd.f32 %v1001_v16, %v2297_v47  ;;  %v2390_v51 = vadd.f32 %v1002_v61, %v2300_v36 }
 0x158   : > { %v1052_v61 = vmax.f32 %v2352_v56, 0.0 }
 0x15c   : > { %v964_v11 = vpop.permute.xlu0 %963  ;;  %v969_v8 = vpop.permute.xlu1 %968 }
 0x15d   : > { %v1005_v33 = vmul.f32 %v2246_v22, %v964_v11  ;;  %v1006_v38 = vmul.f32 %v2248_v25, %v964_v11  ;;  %v1007_v2 = vmul.f32 %v2246_v22, %v969_v8  ;;  %v1008_v6 = vmul.f32 %v2248_v25, %v969_v8 }
 0x15e   : > { %v1044_v22 = vmax.f32 %v2258_v31, 0.0  ;;  %v1053_v11 = vmax.f32 %v2355_v35, 0.0  ;;  %v1054_v8 = vmax.f32 %v2358_v29, 0.0  ;;  %v1057_v29 = vmax.f32 %v2365_v10, 0.0 }
 0x15f   : > { %v2396_v14 = vadd.f32 %v1007_v2, %v872_v46  ;;  %v2398_v7 = vadd.f32 %v1008_v6, %v873_v13  ;;  %v2401_v47 = vadd.f32 %v1005_v33, %v2234_v45  ;;  %v2404_v36 = vadd.f32 %v1006_v38, %v2236_v28  ;;  %v1137_v6 = vpop.permute.xlu2 %1136 }
 0x160   : > { %v1045_v46 = vmax.f32 %v2333_v62, 0.0  ;;  %v1046_v13 = vmax.f32 %v2336_v44, 0.0  ;;  %v1170_v45 = vmul.f32 %v1092_v30, %v1042_v1  ;;  %v1047_v28 = vmax.f32 %v2339_v5, 0.0 }
 0x161   : > { %v1049_v62 = vmax.f32 %v2274_v57, 0.0  ;;  %v1050_v44 = vmax.f32 %v2276_v4, 0.0  ;;  %v1181_v2 = vmul.f32 %v1122_v53, %v1053_v11  ;;  %v1182_v4 = vmul.f32 %v1122_v53, %v1054_v8 }
 0x162   : > { %v1175_v31 = vmul.f32 %v1107_v32, %v1047_v28 }
 0x164   : > { %v1097_v41 = vpop.permute.xlu0 %1096  ;;  %v1102_v25 = vpop.permute.xlu1 %1101 }
 0x165   : > { %v1171_v12 = vmul.f32 %v1097_v41, %v1043_v3  ;;  %v1172_v18 = vmul.f32 %v1097_v41, %v1044_v22  ;;  %v1173_v40 = vmul.f32 %v1102_v25, %v1045_v46  ;;  %v1174_v39 = vmul.f32 %v1102_v25, %v1046_v13 }
 0x166   : > { %v1055_v3 = vmax.f32 %v2292_v23, 0.0  ;;  %v1056_v22 = vmax.f32 %v2294_v15, 0.0  ;;  %v1058_v13 = vmax.f32 %v2368_v59, 0.0 }
 0x167   : > { %v1201_v60 = vadd.f32 %v1171_v12, %v1169_v49  ;;  %v1222_v19 = vadd.f32 %v1172_v18, %v1170_v45  ;;  %v1059_v49 = vmax.f32 %v2371_v54, 0.0  ;;  %v1060_v45 = vmax.f32 %v2374_v27, 0.0 }
 0x168   : > { %v1063_v27 = vmax.f32 %v2381_v0, 0.0 }
 0x169   : > { %v1202_v63 = vadd.f32 %v1201_v60, %v1173_v40  ;;  %v1223_v48 = vadd.f32 %v1222_v19, %v1174_v39  ;;  %v1187_v55 = vmul.f32 %v1137_v6, %v1059_v49  ;;  %v1188_v15 = vmul.f32 %v1137_v6, %v1060_v45  ;;  %v1152_v19 = vpop.permute.xlu2 %1151 }
 0x16a   : > { %v1061_v40 = vmax.f32 %v2310_v52, 0.0  ;;  %v1062_v39 = vmax.f32 %v2312_v42, 0.0 }
 0x16b   : > { %v1203_v30 = vadd.f32 %v1202_v63, %v1175_v31  ;;  %v1224_v37 = vadd.f32 %v1223_v48, %v1176_v50  ;;  %v1064_v48 = vmax.f32 %v2384_v24, 0.0 }
 0x16c   : > { %v1112_v17 = vpop.permute.xlu0 %1111  ;;  %v1117_v20 = vpop.permute.xlu1 %1116 }
 0x16d   : > { %v1177_v5 = vmul.f32 %v1112_v17, %v1049_v62  ;;  %v1178_v16 = vmul.f32 %v1112_v17, %v1050_v44  ;;  %v1179_v38 = vmul.f32 %v1117_v20, %v1051_v21  ;;  %v1180_v57 = vmul.f32 %v1117_v20, %v1052_v61 }
 0x16e   : > { %v1065_v62 = vmax.f32 %v2387_v43, 0.0  ;;  %v1066_v44 = vmax.f32 %v2390_v51, 0.0  ;;  %v1067_v21 = vmax.f32 %v2328_v34, 0.0  ;;  %v1068_v61 = vmax.f32 %v2330_v9, 0.0 }
 0x16f   : > { %v1204_v32 = vadd.f32 %v1203_v30, %v1177_v5  ;;  %v1225_v33 = vadd.f32 %v1224_v37, %v1178_v16  ;;  %v1069_v51 = vmax.f32 %v2401_v47, 0.0 }
 0x170   : > { %v1193_v20 = vmul.f32 %v1152_v19, %v1065_v62  ;;  %v1194_v42 = vmul.f32 %v1152_v19, %v1066_v44 }
 0x171   : > { %v1205_v26 = vadd.f32 %v1204_v32, %v1179_v38  ;;  %v1226_v1 = vadd.f32 %v1225_v33, %v1180_v57  ;;  %v1070_v33 = vmax.f32 %v2404_v36, 0.0  ;;  %v1167_v38 = vpop.permute.xlu2 %1166  ;;  %v1071_v57 = vmax.f32 %v2396_v14, 0.0 }
 0x173   : > { %v1206_v58 = vadd.f32 %v1205_v26, %v1181_v2  ;;  %v1227_v41 = vadd.f32 %v1226_v1, %v1182_v4  ;;  %v1072_v2 = vmax.f32 %v2398_v7, 0.0  ;;  %v1199_v26 = vmul.f32 %v1167_v38, %v1071_v57 }
 0x174   : > { %v1127_v56 = vpop.permute.xlu0 %1126  ;;  %v1132_v25 = vpop.permute.xlu1 %1131 }
 0x175   : > { %v1183_v35 = vmul.f32 %v1127_v56, %v1055_v3  ;;  %v1184_v46 = vmul.f32 %v1127_v56, %v1056_v22  ;;  %v1185_v28 = vmul.f32 %v1132_v25, %v1057_v29  ;;  %v1186_v23 = vmul.f32 %v1132_v25, %v1058_v13 }
 0x176   : > { %v1200_v1 = vmul.f32 %v1167_v38, %v1072_v2 }
 0x177   : > { %v1207_v12 = vadd.f32 %v1206_v58, %v1183_v35  ;;  %v1228_v18 = vadd.f32 %v1227_v41, %v1184_v46 }
 0x179   : > { %v1208_v53 = vadd.f32 %v1207_v12, %v1185_v28  ;;  %v1229_v60 = vadd.f32 %v1228_v18, %v1186_v23  ;;  %v1258_v28 = vlaneseq }
 0x17b   : > { %v1209_v10 = vadd.f32 %v1208_v53, %v1187_v55  ;;  %v1230_v31 = vadd.f32 %v1229_v60, %v1188_v15  ;;  %vm1260_vm1 = vcmp.lt.s32.totalorder %v1258_v28, 256 }
 0x17c   : > { %v1142_v59 = vpop.permute.xlu0 %1141  ;;  %v1147_v50 = vpop.permute.xlu1 %1146 }
 0x17d   : > { %v1189_v54 = vmul.f32 %v1142_v59, %v1061_v40  ;;  %v1190_v63 = vmul.f32 %v1142_v59, %v1062_v39  ;;  %v1191_v17 = vmul.f32 %v1147_v50, %v1063_v27  ;;  %v1192_v52 = vmul.f32 %v1147_v50, %v1064_v48 }
 0x17f   : > { %v1210_v30 = vadd.f32 %v1209_v10, %v1189_v54  ;;  %v1231_v37 = vadd.f32 %v1230_v31, %v1190_v63 }
 0x181   : > { %v1211_v5 = vadd.f32 %v1210_v30, %v1191_v17  ;;  %v1232_v16 = vadd.f32 %v1231_v37, %v1192_v52 }
 0x183   : > { %v1212_v11 = vadd.f32 %v1211_v5, %v1193_v20  ;;  %v1233_v0 = vadd.f32 %v1232_v16, %v1194_v42 }
 0x184   : > { %v1157_v8 = vpop.permute.xlu0 %1156  ;;  %v1162_v24 = vpop.permute.xlu1 %1161 }
 0x185   : > { %v1195_v32 = vmul.f32 %v1157_v8, %v1067_v21  ;;  %v1196_v43 = vmul.f32 %v1157_v8, %v1068_v61  ;;  %v1197_v6 = vmul.f32 %v1162_v24, %v1069_v51  ;;  %v1198_v9 = vmul.f32 %v1162_v24, %v1070_v33 }
 0x187   : > { %v1213_v4 = vadd.f32 %v1212_v11, %v1195_v32  ;;  %v1234_v34 = vadd.f32 %v1233_v0, %v1196_v43 }
 0x189   : > { %v1214_v3 = vadd.f32 %v1213_v4, %v1197_v6  ;;  %v1235_v22 = vadd.f32 %v1234_v34, %v1198_v9 }
 0x18b   : > { %v1215_v58 = vadd.f32 %v1214_v3, %v1199_v26  ;;  %v1236_v41 = vadd.f32 %v1235_v22, %v1200_v1 }
 0x18c   : > { %v1247_v29 = vpop.permute.xlu0 %1246 }
 0x18d   : > { %v1216_v47 = vrot.slane %v1215_v58, 4  ;;  %v1237_v56 = vrot.slane %v1236_v41, 4  ;;  %v1249_v18 = vperm.slane %v1247_v29, 0 }
 0x18f   : > { %v1217_v36 = vadd.f32 %v1216_v47, %v1215_v58  ;;  %v1238_v25 = vadd.f32 %v1237_v56, %v1236_v41 }
 0x191   : > { %v1218_v14 = vrot.slane %v1217_v36, 2  ;;  %v1239_v35 = vrot.slane %v1238_v25, 2 }
 0x193   : > { %v1219_v46 = vadd.f32 %v1218_v14, %v1217_v36  ;;  %v1240_v7 = vadd.f32 %v1239_v35, %v1238_v25 }
 0x195   : > { %v1220_v13 = vrot.slane %v1219_v46, 1  ;;  %v1241_v49 = vrot.slane %v1240_v7, 1 }
 0x197   : > { %v1221_v45 = vadd.f32 %v1220_v13, %v1219_v46  ;;  %v1242_v12 = vadd.f32 %v1241_v49, %v1240_v7 }
 0x199   : > { %v1251_v23 = vadd.f32 %v1249_v18, %v1242_v12  ;;  %v1250_v55 = vadd.f32 %v1249_v18, %v1221_v45 }
 0x19b   : > { %v1254_v15 = vrot.slane %v1251_v23, 7 }
 0x19d   : > { %v1256_v53 = vsel %vm1255_vm0, %v1250_v55, %v1254_v15 }
 0x19e   : > { %1262 = vst.msk [vmem:[%s259_s30] sm:$0x3] %vm1260_vm1, %v1256_v53 }
 0x19f   : > { %1518 = shalt.err (!%p1515_p5)
}
 0x1a0   : > { %1432 = dma.vmem_to_hbm [thread:$0]  (%p1645_p4), %s1279_s8, 32, %s1281_s9, %s1264_s23  }
 0x1a1 PF: > { %p1438_p6 = scmp.ge.s32.totalorder %s1569_s25, 2  ;;  %s1292_s18 = sand.u32 1, %s1549_s20  }
 0x1a2   : > { %s1293_s19 = scalar_lea.sflag [#allocation4], %s1292_s18 }
 0x1a3   : > { %p1435_p7 = pnand %p1438_p6, %p1652_p8 }
 0x1a5   : > { %p1436_p9 = pneg %p1435_p7 }
 0x1a7   : > { %1544 = dma.done.wait (%p1436_p9), %s1293_s19, 32  }
 0x1a8   : > { %1546 = vsyncadd (%p1436_p9), %s1293_s19, 4294967264  ;;  %s20_s25 = sadd.s32 1, %s1569_s25   ;;  %s2483_s20 = smov %s1553_s21 }
 0x1a9   : > { %p17_p10 = scmp.ge.s32.totalorder %s20_s25, 4   ;;  %s2484_s21 = smov %s1557_s22 }
 0x1aa   : > { %s2485_s22 = smov %s1658_s7  ;;  %s2486_s23 = smov %s1565_s24 }
 0x1ab   : > { %s2487_s24 = smov %s2489_s27  ;;  %19 = sbr.rel (!%p17_p10) target bundleno = 7 (0x7), region = 81 }
 0x1b0   :  { %1299 = vsyncpa [#allocation4], 1 }
 0x1b1   :  { %1301 = vsyncpa [#allocation4 + $0x1], 1 }

</bundles_post_ra>
